<compile_context>
chip_gen: v6e
topology: v6e:2x2x1
jax: 0.10.0
libtpu: 0.0.40
codegen_flags: <defaults>
</compile_context>

<pallas_src>
import functools

import jax
import jax.numpy as jnp
from jax.experimental import pallas as pl
from jax.experimental.pallas import tpu as pltpu


def _mylinear_kernel(x_ref, w_ref, b_ref, o_ref, acc_ref):
    k = pl.program_id(2)

    @pl.when(k == 0)
    def _():
        acc_ref[...] = jnp.zeros_like(acc_ref)

    # Hot path: MXU matmul with f32 accumulation only.
    acc_ref[...] += jnp.dot(
        x_ref[...], w_ref[...], preferred_element_type=jnp.float32
    )

    @pl.when(k == pl.num_programs(2) - 1)
    def _():
        # Epilogue once per output tile: bias (broadcast over rows) + ReLU + cast.
        out = jnp.maximum(acc_ref[...] + b_ref[...], 0.0)
        o_ref[...] = out.astype(o_ref.dtype)


def _round_up(x, m):
    return ((x + m - 1) // m) * m


@functools.partial(jax.jit, static_argnames=("tm", "tn", "tk"))
def mylinear(x, weight, bias, *, tm=256, tn=256, tk=256):
    """Forward pass of MyLinear: relu(x @ weight + bias)."""
    batch, in_units = x.shape
    in_units_w, units = weight.shape
    assert in_units == in_units_w
    assert bias.shape == (units,)

    # Clamp tiles to the (TPU-aligned) problem size so small shapes still work.
    tm = min(tm, _round_up(batch, 8))      # sublane-aligned rows (f32)
    tn = min(tn, _round_up(units, 128))    # lane-dense output tiles
    tk = min(tk, _round_up(in_units, 128)) # full-depth MXU passes
    assert tm % 8 == 0 and tn % 128 == 0 and tk % 128 == 0

    mp = _round_up(batch, tm)
    np_ = _round_up(units, tn)
    kp = _round_up(in_units, tk)

    # Zero padding is exact for matmul + bias + ReLU; padded region is sliced off.
    xp = jnp.pad(x, ((0, mp - batch), (0, kp - in_units)))
    wp = jnp.pad(weight, ((0, kp - in_units), (0, np_ - units)))
    bp = jnp.pad(bias, (0, np_ - units)).reshape(1, np_)

    grid = (mp // tm, np_ // tn, kp // tk)

    out_padded = pl.pallas_call(
        _mylinear_kernel,
        out_shape=jax.ShapeDtypeStruct((mp, np_), x.dtype),
        grid_spec=pltpu.PrefetchScalarGridSpec(
            num_scalar_prefetch=0,
            grid=grid,
            in_specs=[
                pl.BlockSpec((tm, tk), lambda i, j, k: (i, k)),
                pl.BlockSpec((tk, tn), lambda i, j, k: (k, j)),
                pl.BlockSpec((1, tn), lambda i, j, k: (0, j)),  # bias: per N-tile
            ],
            out_specs=pl.BlockSpec((tm, tn), lambda i, j, k: (i, j)),
            scratch_shapes=[pltpu.VMEM((tm, tn), jnp.float32)],
        ),
        compiler_params=pltpu.CompilerParams(
            dimension_semantics=("parallel", "parallel", "arbitrary"),
            vmem_limit_bytes=48 * 1024 * 1024,  # fits v5e/v6e/v7x budgets
        ),
    )(xp, wp, bp)

    return out_padded[:batch, :units]


if __name__ == "__main__":
    key = jax.random.PRNGKey(0)

    # --- Case 1: module-sized toy shapes (forces padding path). ---
    k_x, k_w, k_b = jax.random.split(key, 3)
    batch, in_units, units = 8, 32, 64
    x = jax.random.normal(k_x, (batch, in_units), dtype=jnp.float32)
    weight = jax.random.normal(k_w, (in_units, units), dtype=jnp.float32)
    bias = jax.random.normal(k_b, (units,), dtype=jnp.float32)

    out = jax.block_until_ready(mylinear(x, weight, bias))
    ref = jnp.maximum(
        jnp.dot(x, weight, preferred_element_type=jnp.float32) + bias, 0.0
    )
    assert out.shape == (batch, units)
    assert jnp.allclose(out, ref, atol=1e-4, rtol=1e-4)

    # --- Case 2: small shapes with forced multi-step (2,2,2) grid to exercise
    #             the K-accumulator and parallel M/N tiling. ---
    k_x2, k_w2, k_b2 = jax.random.split(jax.random.PRNGKey(1), 3)
    b2, k2, n2 = 16, 256, 256
    x2 = jax.random.normal(k_x2, (b2, k2), dtype=jnp.float32)
    w2 = jax.random.normal(k_w2, (k2, n2), dtype=jnp.float32)
    bias2 = jax.random.normal(k_b2, (n2,), dtype=jnp.float32)

    out2 = jax.block_until_ready(mylinear(x2, w2, bias2, tm=8, tn=128, tk=128))
    ref2 = jnp.maximum(
        jnp.dot(x2, w2, preferred_element_type=jnp.float32) + bias2, 0.0
    )
    assert out2.shape == (b2, n2)
    assert jnp.allclose(out2, ref2, atol=1e-3, rtol=1e-3)

    print("KERNEL_OK")
</pallas_src>

<mosaic_0001>
module attributes {stable_mosaic.version = 11 : i64} {
  func.func @_mylinear_kernel(%arg0: i32, %arg1: i32, %arg2: i32, %arg3: memref<8x128xf32, #tpu.memory_space<vmem>>, %arg4: memref<128x128xf32, #tpu.memory_space<vmem>>, %arg5: memref<1x128xf32, #tpu.memory_space<vmem>>, %arg6: memref<8x128xf32, #tpu.memory_space<vmem>>, %arg7: memref<8x128xf32, #tpu.memory_space<vmem>>) attributes {dimension_semantics = [#tpu.dimension_semantics<parallel>, #tpu.dimension_semantics<parallel>, #tpu.dimension_semantics<arbitrary>], iteration_bounds = array<i64: 1, 1, 1>, scalar_prefetch = 0 : i64, scratch_operands = 1 : i64, tpu.core_type = #tpu.core_type<tc>, window_params = [{transform_indices = @transform_0, window_bounds = array<i64: 8, 128>}, {transform_indices = @transform_1, window_bounds = array<i64: 128, 128>}, {transform_indices = @transform_2, window_bounds = array<i64: 1, 128>}, {transform_indices = @transform_3, window_bounds = array<i64: 8, 128>}]} {
    %c0_i32 = arith.constant 0 : i32
    %0 = arith.cmpi eq, %arg2, %c0_i32 : i32
    %1 = arith.extui %0 : i1 to i32
    %c0_i32_0 = arith.constant 0 : i32
    %2 = arith.cmpi ne, %1, %c0_i32_0 : i32
    scf.if %2 {
      %cst_10 = arith.constant 0.000000e+00 : f32
      %12 = vector.broadcast %cst_10 : f32 to vector<8x128xf32>
      %c0_11 = arith.constant 0 : index
      %c0_12 = arith.constant 0 : index
      %13 = vector.load %arg7[%c0_11, %c0_12] : memref<8x128xf32, #tpu.memory_space<vmem>>, vector<8x128xf32>
      tpu.vector_store %arg7[%c0_11, %c0_12], %12 {strides = array<i32>} : memref<8x128xf32, #tpu.memory_space<vmem>>, vector<8x128xf32>,
    } else {
    }
    %c0 = arith.constant 0 : index
    %c0_1 = arith.constant 0 : index
    %3 = vector.load %arg7[%c0, %c0_1] : memref<8x128xf32, #tpu.memory_space<vmem>>, vector<8x128xf32>
    %c0_2 = arith.constant 0 : index
    %c0_3 = arith.constant 0 : index
    %4 = vector.load %arg3[%c0_2, %c0_3] : memref<8x128xf32, #tpu.memory_space<vmem>>, vector<8x128xf32>
    %c0_4 = arith.constant 0 : index
    %c0_5 = arith.constant 0 : index
    %5 = vector.load %arg4[%c0_4, %c0_5] : memref<128x128xf32, #tpu.memory_space<vmem>>, vector<128x128xf32>
    %cst = arith.constant dense<0.000000e+00> : vector<8x128xf32>
    %6 = tpu.matmul %4, %5, %cst {dimension_numbers = #tpu.dot_dimension_numbers<[1], [0], [0], [1], [0, 0, 1, 1], [], []>} : vector<8x128xf32>, vector<128x128xf32>, vector<8x128xf32> -> vector<8x128xf32>
    %7 = arith.addf %3, %6 : vector<8x128xf32>
    %c0_6 = arith.constant 0 : index
    %c0_7 = arith.constant 0 : index
    %8 = vector.load %arg7[%c0_6, %c0_7] : memref<8x128xf32, #tpu.memory_space<vmem>>, vector<8x128xf32>
    tpu.vector_store %arg7[%c0_6, %c0_7], %7 {strides = array<i32>} : memref<8x128xf32, #tpu.memory_space<vmem>>, vector<8x128xf32>,
    %c0_i32_8 = arith.constant 0 : i32
    %9 = arith.cmpi eq, %arg2, %c0_i32_8 : i32
    %10 = arith.extui %9 : i1 to i32
    %c0_i32_9 = arith.constant 0 : i32
    %11 = arith.cmpi ne, %10, %c0_i32_9 : i32
    scf.if %11 {
      %c0_10 = arith.constant 0 : index
      %c0_11 = arith.constant 0 : index
      %12 = vector.load %arg7[%c0_10, %c0_11] : memref<8x128xf32, #tpu.memory_space<vmem>>, vector<8x128xf32>
      %c0_12 = arith.constant 0 : index
      %c0_13 = arith.constant 0 : index
      %13 = vector.load %arg5[%c0_12, %c0_13] : memref<1x128xf32, #tpu.memory_space<vmem>>, vector<1x128xf32>
      %14 = vector.broadcast %13 : vector<1x128xf32> to vector<8x128xf32>
      %15 = arith.addf %12, %14 : vector<8x128xf32>
      %cst_14 = arith.constant 0.000000e+00 : f32
      %16 = vector.broadcast %cst_14 : f32 to vector<8x128xf32>
      %17 = arith.maximumf %15, %16 : vector<8x128xf32>
      %c0_15 = arith.constant 0 : index
      %c0_16 = arith.constant 0 : index
      %18 = vector.load %arg6[%c0_15, %c0_16] : memref<8x128xf32, #tpu.memory_space<vmem>>, vector<8x128xf32>
      tpu.vector_store %arg6[%c0_15, %c0_16], %17 {strides = array<i32>} : memref<8x128xf32, #tpu.memory_space<vmem>>, vector<8x128xf32>,
    } else {
    }
    return
  }
  func.func @transform_0(%arg0: i32, %arg1: i32, %arg2: i32) -> (i32, i32) {
    %c0_i32 = arith.constant 0 : i32
    return %arg0, %arg2 : i32, i32
  }
  func.func @transform_1(%arg0: i32, %arg1: i32, %arg2: i32) -> (i32, i32) {
    %c0_i32 = arith.constant 0 : i32
    return %arg2, %arg1 : i32, i32
  }
  func.func @transform_2(%arg0: i32, %arg1: i32, %arg2: i32) -> (i32, i32) {
    %c0_i32 = arith.constant 0 : i32
    %c0_i32_0 = arith.constant 0 : i32
    return %c0_i32, %arg1 : i32, i32
  }
  func.func @transform_3(%arg0: i32, %arg1: i32, %arg2: i32) -> (i32, i32) {
    %c0_i32 = arith.constant 0 : i32
    return %arg0, %arg1 : i32, i32
  }
}

</mosaic_0001>

<bundles_post_ra>
// kernel: mylinear.1
= control target key start
LH: loop header
LB: loop body
LE: loop exit
PB: predicated region body
PF: predicated region fallthrough
CT: control target
= control target key end

     0   :  { %v216_v1 = vmov 0.0   ;;  %vm217_vm0 = vmmov 0   ;;  %s296_s0 = inlined_call_operand.vmem [shape: f32[8,128], index: 0, kind: input, shape index: {}]   ;;  %s297_s1 = inlined_call_operand.vmem [shape: f32[128,128], index: 1, kind: input, shape index: {}]   ;;  %s298_s2 = inlined_call_operand.vmem [shape: f32[1,128], index: 2, kind: input, shape index: {}]   ;;  %s299_s3 = inlined_call_operand.hbm [shape: f32[8,128], index: 3, kind: output, shape index: {}]  }
   0x1   :  { %v37_v0 = vld [vmem:[%s297_s1 + $0x78] sm:$0xff]  ;;  %156 = vmatprep.subr.mxu0 %v216_v1  ;;  %v36_v2 = vld [vmem:[%s297_s1 + $0x70] sm:$0xff]  ;;  %188 = vmatprep.mubr.msk.f32.mxu0 %vm217_vm0, %v216_v1  ;;  %v35_v3 = vld [vmem:[%s297_s1 + $0x68] sm:$0xff] }
   0x2   :  { %157 = vmatpush3.msra.mxu0 %v37_v0  ;;  %v34_v4 = vld [vmem:[%s297_s1 + $0x60] sm:$0xff] }
   0x3   :  { %158 = vmatprep.subr.mxu0 %v216_v1 }
   0x4   :  { %159 = vmatpush3.msra.mxu0 %v36_v2 }
   0x5   :  { %160 = vmatprep.subr.mxu0 %v216_v1 }
   0x6   :  { %8 = vsyncpa [#allocation4], 0  ;;  %161 = vmatpush3.msra.mxu0 %v35_v3  ;;  %v33_v5 = vld [vmem:[%s297_s1 + $0x58] sm:$0xff]  ;;  %v32_v6 = vld [vmem:[%s297_s1 + $0x50] sm:$0xff]  ;;  %s218_s21 = smov [#allocation3]  }
   0x7   :  { %162 = vmatprep.subr.mxu0 %v216_v1  ;;  %v31_v7 = vld [vmem:[%s297_s1 + $0x48] sm:$0xff]  ;;  %v30_v8 = vld [vmem:[%s297_s1 + $0x40] sm:$0xff]  ;;  %v29_v9 = vld [vmem:[%s297_s1 + $0x38] sm:$0xff]  ;;  %s130_s22 = sshll.u32 %s218_s21, 4  ;;  %s131_s22 = int_to_ptr.vmem [resolvable:$true] %s130_s22 }
   0x8   :  { %163 = vmatpush3.msra.mxu0 %v34_v4  ;;  %v28_v10 = vld [vmem:[%s297_s1 + $0x30] sm:$0xff]  ;;  %v27_v11 = vld [vmem:[%s297_s1 + $0x28] sm:$0xff]  ;;  %v26_v12 = vld [vmem:[%s297_s1 + $0x20] sm:$0xff]  ;;  %p199_p1 = scmp.lt.s32.totalorder %s131_s22, %s131_s22 }
   0x9   :  { %164 = vmatprep.subr.mxu0 %v216_v1  ;;  %v25_v13 = vld [vmem:[%s297_s1 + $0x18] sm:$0xff]  ;;  %v24_v14 = vld [vmem:[%s297_s1 + $0x10] sm:$0xff]  ;;  %v23_v15 = vld [vmem:[%s297_s1 + $0x8] sm:$0xff] }
   0xa   :  { %165 = vmatpush3.msra.mxu0 %v33_v5  ;;  %v22_v16 = vld [vmem:[%s297_s1] sm:$0xff]  ;;  %s194_s1 = scalar_lea.vmem %s131_s22, 128 }
   0xb   :  { %166 = vmatprep.subr.mxu0 %v216_v1  ;;  %v21_v17 = vld [vmem:[%s296_s0] sm:$0xff]  ;;  %p195_p0 = scmp.ne.s32.totalorder %s131_s22, %s194_s1  ;;  %p200_p2 = scmp.lt.s32.totalorder %s194_s1, %s194_s1 }
   0xc   :  { %167 = vmatpush3.msra.mxu0 %v32_v6  ;;  %v138_v18 = vld [vmem:[%s298_s2] ss:$0 sm:$0xff] }
   0xd   :  { %168 = vmatprep.subr.mxu0 %v216_v1  ;;  %p201_p3 = por %p200_p2, %p199_p1 }
   0xe   :  { %169 = vmatpush3.msra.mxu0 %v31_v7 }
   0xf   :  { %170 = vmatprep.subr.mxu0 %v216_v1  ;;  %p202_p4 = pnand %p201_p3, %p195_p0 }
  0x10   :  { %171 = vmatpush3.msra.mxu0 %v30_v8 }
  0x11   :  { %172 = vmatprep.subr.mxu0 %v216_v1 }
  0x12   :  { %173 = vmatpush3.msra.mxu0 %v29_v9 }
  0x13   :  { %174 = vmatprep.subr.mxu0 %v216_v1 }
  0x14   :  { %175 = vmatpush3.msra.mxu0 %v28_v10 }
  0x15   :  { %176 = vmatprep.subr.mxu0 %v216_v1 }
  0x16   :  { %177 = vmatpush3.msra.mxu0 %v27_v11 }
  0x17   :  { %178 = vmatprep.subr.mxu0 %v216_v1 }
  0x18   :  { %179 = vmatpush3.msra.mxu0 %v26_v12 }
  0x19   :  { %180 = vmatprep.subr.mxu0 %v216_v1 }
  0x1a   :  { %181 = vmatpush3.msra.mxu0 %v25_v13 }
  0x1b   :  { %182 = vmatprep.subr.mxu0 %v216_v1 }
  0x1c   :  { %183 = vmatpush3.msra.mxu0 %v24_v14 }
  0x1d   :  { %184 = vmatprep.subr.mxu0 %v216_v1 }
  0x1e   :  { %185 = vmatpush3.msra.mxu0 %v23_v15 }
  0x1f   :  { %186 = vmatprep.subr.mxu0 %v216_v1 }
  0x20   :  { %187 = vmatpush3.msra.mxu0 %v22_v16 }
  0x21   :  { %189 = vmatmul.mubr.f32.vlgmr.msra.gmra.mxu0 %v21_v17 }
  0xe1   :  { %v104_v19 = vpop.f32.mrf.mxu0 }
  0xe2   :  { %v121_v20 = vadd.f32 %v138_v18, %v104_v19 }
  0xe3   :  { %v190_v21 = vpop.f32.mrf.mxu0 }
  0xe4   :  { %v122_v22 = vmax.f32 %v121_v20, 0.0 }
  0xe6   :  { %123 = vst [vmem:[#allocation3] sm:$0xff] %v122_v22 }
  0xe7   :  { %205 = shalt.err (!%p202_p4)
}
  0xe8   :  { %133 = dma.vmem_to_hbm [thread:$0]  %s131_s22, 128, %s299_s3, [#allocation4]  }
  0xe9   :  { %214 = dma.done.wait [#allocation4], 128  }
  0xea   :  { %215 = vsyncadd [#allocation4], 4294967168 }
  0xeb   :  { %137 = vsyncpa [#allocation4], 1 }

</bundles_post_ra>
